<compile_context>
chip_gen: v5e
topology: v5e:2x2
jax: 0.10.0
libtpu: 0.0.40
codegen_flags: <defaults>
</compile_context>

<pallas_src>
import math

import jax
import jax.numpy as jnp
from jax.experimental import pallas as pl
from jax.experimental.pallas import tpu as pltpu


def _round_up(n, m):
    return ((n + m - 1) // m) * m


def feedforward_kernel(x_ref, w1_ref, w2_ref, scales_ref, o_ref):
    x = x_ref[...]                                            # (TM, D) f32
    w1s = scales_ref[0]                                       # per-tensor weight scales (SMEM)
    w2s = scales_ref[1]

    # ---- BitLinearNew #1: RMSNorm -> per-row absmax int grid -> ternary GEMM
    xn = x * jax.lax.rsqrt(jnp.mean(x * x, axis=-1, keepdims=True) + 1e-6)
    amax1 = jnp.maximum(jnp.max(jnp.abs(xn), axis=-1, keepdims=True), 1e-5)
    xi = jnp.round(xn * (127.0 / amax1))                      # ints in [-127,127]; clip not needed
    h = jnp.dot(xi.astype(jnp.bfloat16), w1_ref[...].astype(jnp.bfloat16),
                preferred_element_type=jnp.float32)           # (TM, H), exact integer products
    h = h * (amax1 * (w1s * (1.0 / 127.0)))                   # dequant, no per-row vector divide
    h = jnp.maximum(h, 0.0)                                   # ReLU
    # TODO(synk): nn.Dropout(p) treated as identity (eval-mode semantics).

    # ---- BitLinearNew #2
    hn = h * jax.lax.rsqrt(jnp.mean(h * h, axis=-1, keepdims=True) + 1e-6)
    amax2 = jnp.maximum(jnp.max(jnp.abs(hn), axis=-1, keepdims=True), 1e-5)
    hi = jnp.round(hn * (127.0 / amax2))
    y = jnp.dot(hi.astype(jnp.bfloat16), w2_ref[...].astype(jnp.bfloat16),
                preferred_element_type=jnp.float32)           # (TM, D)
    o_ref[...] = y * (amax2 * (w2s * (1.0 / 127.0)))


def _choose_tiling(M, tm):
    """Pick the row-tile size and padded row count; keep >= 2 grid steps when possible."""
    tm_eff = min(tm, _round_up(M, 8))
    Mp = _round_up(M, tm_eff)
    if Mp // tm_eff < 2 and Mp >= 16:        # give the 'parallel' axis 2 steps (v7x megacore)
        tm_eff = _round_up(Mp // 2, 8)
        Mp = _round_up(M, tm_eff)
    return tm_eff, Mp


def _vmem_limit_bytes(tm, D, H):
    w_int8 = 2 * D * H                        # both ternary weights, int8, single-buffered
    w_bf16 = 2 * 2 * D * H                    # worst-case bf16 upcast temporaries
    io_tiles = 2 * 2 * tm * D * 4             # x + out tiles, double-buffered, f32
    interm = 6 * tm * H * 4                   # h / hn / quant temporaries, f32
    need = w_int8 + w_bf16 + io_tiles + interm + (4 << 20)    # + compiler scratch slack
    try:
        cap = int(pltpu.get_tpu_info().vmem_capacity_bytes * 0.85)
    except Exception:
        cap = 56 << 20                        # stays inside v7x's 64 MiB per-core VMEM
    return int(min(max(need, 32 << 20), cap))


def feedforward_forward(x, w1, w2, *, tm=256):
    """x: (B, T, D) f32.  w1: (4D, D), w2: (D, 4D) in PyTorch (out, in) layout.

    tm=256 targets the 256-wide MXUs of v6e/v7x; use tm=128 on v5e.
    """
    B, T, D = x.shape
    H = w1.shape[0]
    M = B * T

    # Ternary (absmean) weight quantization — hoisted out of the kernel and
    # stored as int8 (1 byte/elem resident + DMA; upcast to bf16 in-kernel).
    def ternarize(w):
        s = jnp.maximum(jnp.mean(jnp.abs(w)), 1e-5)
        wi = jnp.clip(jnp.round(w / s), -1.0, 1.0)
        return wi.astype(jnp.int8), s

    w1i, w1s = ternarize(w1)
    w2i, w2s = ternarize(w2)
    w1i_t = w1i.T                                              # (D, H) int8, values {-1,0,1}
    w2i_t = w2i.T                                              # (H, D) int8
    scales = jnp.stack([w1s, w2s]).astype(jnp.float32)         # (2,) -> SMEM

    xm = x.reshape(M, D).astype(jnp.float32)
    tm_eff, Mp = _choose_tiling(M, tm)
    if Mp != M:
        xm = jnp.pad(xm, ((0, Mp - M), (0, 0)))                # zero rows are harmless

    cost = pl.CostEstimate(
        flops=4 * M * D * H,                                   # two GEMMs
        transcendentals=2 * M,                                 # two rsqrts per row
        bytes_accessed=2 * M * D * 4 + 2 * D * H,              # x + out + int8 weights
    )

    out = pl.pallas_call(
        feedforward_kernel,
        out_shape=jax.ShapeDtypeStruct((Mp, D), jnp.float32),
        grid=(Mp // tm_eff,),
        in_specs=[
            pl.BlockSpec((tm_eff, D), lambda i: (i, 0)),       # x row-tile (pipelined)
            pl.BlockSpec((D, H), lambda i: (0, 0),             # w1: resident, single-buffered
                         pipeline_mode=pl.Buffered(1)),
            pl.BlockSpec((H, D), lambda i: (0, 0),             # w2: resident, single-buffered
                         pipeline_mode=pl.Buffered(1)),
            pl.BlockSpec(memory_space=pltpu.MemorySpace.SMEM), # weight scales
        ],
        out_specs=pl.BlockSpec((tm_eff, D), lambda i: (i, 0)),
        compiler_params=pltpu.CompilerParams(
            dimension_semantics=("parallel",),
            vmem_limit_bytes=_vmem_limit_bytes(tm_eff, D, H)),
        cost_estimate=cost,
    )(xm, w1i_t, w2i_t, scales)
    return out[:M].reshape(B, T, D)


# ---------------- pure-JAX reference (mirrors the PyTorch forward) ----------------
def _bitlinear_ref(x, w):
    hp = jax.lax.Precision.HIGHEST
    xn = x * jax.lax.rsqrt(jnp.mean(x * x, axis=-1, keepdims=True) + 1e-6)
    s = 127.0 / jnp.maximum(jnp.max(jnp.abs(xn), axis=-1, keepdims=True), 1e-5)
    xq = jnp.clip(jnp.round(xn * s), -128.0, 127.0) / s
    ws = jnp.maximum(jnp.mean(jnp.abs(w)), 1e-5)
    wq = jnp.clip(jnp.round(w / ws), -1.0, 1.0) * ws
    return jnp.dot(xq, wq.T, precision=hp)


def feedforward_ref(x, w1, w2):
    h = jax.nn.relu(_bitlinear_ref(x, w1))
    return _bitlinear_ref(h, w2)                               # dropout == identity (eval)


if __name__ == "__main__":
    # FeedForward(n_embd=32, dropout=0.1), input (batch=2, seq=8, n_embd=32)
    B, T, n_embd = 2, 8, 32
    H = 4 * n_embd

    key = jax.random.PRNGKey(0)
    kx, k1, k2 = jax.random.split(key, 3)
    x = jax.random.normal(kx, (B, T, n_embd), jnp.float32)
    # nn.Linear default init: U(-1/sqrt(fan_in), 1/sqrt(fan_in))
    w1 = jax.random.uniform(k1, (H, n_embd), jnp.float32,
                            -1.0 / math.sqrt(n_embd), 1.0 / math.sqrt(n_embd))
    w2 = jax.random.uniform(k2, (n_embd, H), jnp.float32,
                            -1.0 / math.sqrt(H), 1.0 / math.sqrt(H))

    out = jax.block_until_ready(feedforward_forward(x, w1, w2))
    ref = feedforward_ref(x, w1, w2)

    assert out.shape == x.shape
    err = float(jnp.max(jnp.abs(out - ref)))
    assert jnp.allclose(out, ref, atol=2e-3, rtol=2e-3), err
    print("KERNEL_OK")
</pallas_src>

<mosaic_0001>
module attributes {stable_mosaic.version = 11 : i64} {
  func.func @feedforward_kernel(%arg0: i32, %arg1: memref<8x32xf32, #tpu.memory_space<vmem>>, %arg2: memref<32x128xi8, #tpu.memory_space<vmem>>, %arg3: memref<128x32xi8, #tpu.memory_space<vmem>>, %arg4: memref<2xf32, #tpu.memory_space<smem>>, %arg5: memref<8x32xf32, #tpu.memory_space<vmem>>) attributes {dimension_semantics = [#tpu.dimension_semantics<parallel>], iteration_bounds = array<i64: 2>, scalar_prefetch = 0 : i64, scratch_operands = 0 : i64, tpu.core_type = #tpu.core_type<tc>, window_params = [{transform_indices = @transform_0, window_bounds = array<i64: 8, 32>}, {pipeline_mode = #tpu.pipeline_mode<synchronous>, transform_indices = @transform_1, window_bounds = array<i64: 32, 128>}, {pipeline_mode = #tpu.pipeline_mode<synchronous>, transform_indices = @transform_2, window_bounds = array<i64: 128, 32>}, {transform_indices = @transform_3, window_bounds = array<i64: 2>}, {transform_indices = @transform_4, window_bounds = array<i64: 8, 32>}]} {
    %c0 = arith.constant 0 : index
    %c0_0 = arith.constant 0 : index
    %0 = vector.load %arg1[%c0, %c0_0] : memref<8x32xf32, #tpu.memory_space<vmem>>, vector<8x32xf32>
    %c0_1 = arith.constant 0 : index
    %1 = memref.load %arg4[%c0_1] : memref<2xf32, #tpu.memory_space<smem>>
    %c1 = arith.constant 1 : index
    %2 = memref.load %arg4[%c1] : memref<2xf32, #tpu.memory_space<smem>>
    %3 = arith.mulf %0, %0 : vector<8x32xf32>
    %cst = arith.constant dense<0.000000e+00> : vector<8xf32>
    %4 = vector.multi_reduction <add>, %3, %cst [1] : vector<8x32xf32> to vector<8xf32>
    %5 = vector.shape_cast %4 : vector<8xf32> to vector<8x1xf32>
    %cst_2 = arith.constant 3.200000e+01 : f32
    %6 = vector.broadcast %cst_2 : f32 to vector<8x1xf32>
    %7 = arith.divf %5, %6 : vector<8x1xf32>
    %cst_3 = arith.constant 9.99999997E-7 : f32
    %8 = vector.broadcast %cst_3 : f32 to vector<8x1xf32>
    %9 = arith.addf %7, %8 : vector<8x1xf32>
    %10 = math.rsqrt %9 : vector<8x1xf32>
    %11 = vector.broadcast %10 : vector<8x1xf32> to vector<8x32xf32>
    %12 = arith.mulf %0, %11 : vector<8x32xf32>
    %13 = math.absf %12 : vector<8x32xf32>
    %cst_4 = arith.constant dense<0xFF800000> : vector<8xf32>
    %14 = vector.multi_reduction <maximumf>, %13, %cst_4 [1] : vector<8x32xf32> to vector<8xf32>
    %15 = vector.shape_cast %14 : vector<8xf32> to vector<8x1xf32>
    %cst_5 = arith.constant 9.99999974E-6 : f32
    %16 = vector.broadcast %cst_5 : f32 to vector<8x1xf32>
    %17 = arith.maximumf %15, %16 : vector<8x1xf32>
    %cst_6 = arith.constant 1.270000e+02 : f32
    %18 = vector.broadcast %cst_6 : f32 to vector<8x1xf32>
    %19 = arith.divf %18, %17 : vector<8x1xf32>
    %20 = vector.broadcast %19 : vector<8x1xf32> to vector<8x32xf32>
    %21 = arith.mulf %12, %20 : vector<8x32xf32>
    %22 = math.roundeven %21 : vector<8x32xf32>
    %23 = arith.truncf %22 : vector<8x32xf32> to vector<8x32xbf16>
    %c0_7 = arith.constant 0 : index
    %c0_8 = arith.constant 0 : index
    %24 = vector.load %arg2[%c0_7, %c0_8] : memref<32x128xi8, #tpu.memory_space<vmem>>, vector<32x128xi8>
    %25 = arith.sitofp %24 : vector<32x128xi8> to vector<32x128xbf16>
    %cst_9 = arith.constant dense<0.000000e+00> : vector<8x128xf32>
    %26 = tpu.matmul %23, %25, %cst_9 {dimension_numbers = #tpu.dot_dimension_numbers<[1], [0], [0], [1], [0, 0, 1, 1], [], []>} : vector<8x32xbf16>, vector<32x128xbf16>, vector<8x128xf32> -> vector<8x128xf32>
    %cst_10 = arith.constant 0.00787401571 : f32
    %27 = arith.mulf %1, %cst_10 : f32
    %28 = vector.broadcast %27 : f32 to vector<8x1xf32>
    %29 = arith.mulf %17, %28 : vector<8x1xf32>
    %30 = vector.broadcast %29 : vector<8x1xf32> to vector<8x128xf32>
    %31 = arith.mulf %26, %30 : vector<8x128xf32>
    %cst_11 = arith.constant 0.000000e+00 : f32
    %32 = vector.broadcast %cst_11 : f32 to vector<8x128xf32>
    %33 = arith.maximumf %31, %32 : vector<8x128xf32>
    %34 = arith.mulf %33, %33 : vector<8x128xf32>
    %cst_12 = arith.constant dense<0.000000e+00> : vector<8xf32>
    %35 = vector.multi_reduction <add>, %34, %cst_12 [1] : vector<8x128xf32> to vector<8xf32>
    %36 = vector.shape_cast %35 : vector<8xf32> to vector<8x1xf32>
    %cst_13 = arith.constant 1.280000e+02 : f32
    %37 = vector.broadcast %cst_13 : f32 to vector<8x1xf32>
    %38 = arith.divf %36, %37 : vector<8x1xf32>
    %cst_14 = arith.constant 9.99999997E-7 : f32
    %39 = vector.broadcast %cst_14 : f32 to vector<8x1xf32>
    %40 = arith.addf %38, %39 : vector<8x1xf32>
    %41 = math.rsqrt %40 : vector<8x1xf32>
    %42 = vector.broadcast %41 : vector<8x1xf32> to vector<8x128xf32>
    %43 = arith.mulf %33, %42 : vector<8x128xf32>
    %44 = math.absf %43 : vector<8x128xf32>
    %cst_15 = arith.constant dense<0xFF800000> : vector<8xf32>
    %45 = vector.multi_reduction <maximumf>, %44, %cst_15 [1] : vector<8x128xf32> to vector<8xf32>
    %46 = vector.shape_cast %45 : vector<8xf32> to vector<8x1xf32>
    %cst_16 = arith.constant 9.99999974E-6 : f32
    %47 = vector.broadcast %cst_16 : f32 to vector<8x1xf32>
    %48 = arith.maximumf %46, %47 : vector<8x1xf32>
    %cst_17 = arith.constant 1.270000e+02 : f32
    %49 = vector.broadcast %cst_17 : f32 to vector<8x1xf32>
    %50 = arith.divf %49, %48 : vector<8x1xf32>
    %51 = vector.broadcast %50 : vector<8x1xf32> to vector<8x128xf32>
    %52 = arith.mulf %43, %51 : vector<8x128xf32>
    %53 = math.roundeven %52 : vector<8x128xf32>
    %54 = arith.truncf %53 : vector<8x128xf32> to vector<8x128xbf16>
    %c0_18 = arith.constant 0 : index
    %c0_19 = arith.constant 0 : index
    %55 = vector.load %arg3[%c0_18, %c0_19] : memref<128x32xi8, #tpu.memory_space<vmem>>, vector<128x32xi8>
    %56 = arith.sitofp %55 : vector<128x32xi8> to vector<128x32xbf16>
    %cst_20 = arith.constant dense<0.000000e+00> : vector<8x32xf32>
    %57 = tpu.matmul %54, %56, %cst_20 {dimension_numbers = #tpu.dot_dimension_numbers<[1], [0], [0], [1], [0, 0, 1, 1], [], []>} : vector<8x128xbf16>, vector<128x32xbf16>, vector<8x32xf32> -> vector<8x32xf32>
    %cst_21 = arith.constant 0.00787401571 : f32
    %58 = arith.mulf %2, %cst_21 : f32
    %59 = vector.broadcast %58 : f32 to vector<8x1xf32>
    %60 = arith.mulf %48, %59 : vector<8x1xf32>
    %61 = vector.broadcast %60 : vector<8x1xf32> to vector<8x32xf32>
    %62 = arith.mulf %57, %61 : vector<8x32xf32>
    %c0_22 = arith.constant 0 : index
    %c0_23 = arith.constant 0 : index
    %63 = vector.load %arg5[%c0_22, %c0_23] : memref<8x32xf32, #tpu.memory_space<vmem>>, vector<8x32xf32>
    tpu.vector_store %arg5[%c0_22, %c0_23], %62 {strides = array<i32>} : memref<8x32xf32, #tpu.memory_space<vmem>>, vector<8x32xf32>,
    return
  }
  func.func @transform_0(%arg0: i32) -> (i32, i32) {
    %c0_i32 = arith.constant 0 : i32
    %c0_i32_0 = arith.constant 0 : i32
    return %arg0, %c0_i32 : i32, i32
  }
  func.func @transform_1(%arg0: i32) -> (i32, i32) {
    %c0_i32 = arith.constant 0 : i32
    %c0_i32_0 = arith.constant 0 : i32
    %c0_i32_1 = arith.constant 0 : i32
    return %c0_i32, %c0_i32_0 : i32, i32
  }
  func.func @transform_2(%arg0: i32) -> (i32, i32) {
    %c0_i32 = arith.constant 0 : i32
    %c0_i32_0 = arith.constant 0 : i32
    %c0_i32_1 = arith.constant 0 : i32
    return %c0_i32, %c0_i32_0 : i32, i32
  }
  func.func @transform_3(%arg0: i32) -> i32 {
    %c0_i32 = arith.constant 0 : i32
    %c0_i32_0 = arith.constant 0 : i32
    return %c0_i32 : i32
  }
  func.func @transform_4(%arg0: i32) -> (i32, i32) {
    %c0_i32 = arith.constant 0 : i32
    %c0_i32_0 = arith.constant 0 : i32
    return %arg0, %c0_i32 : i32, i32
  }
}

</mosaic_0001>

<bundles_post_ra>
// kernel: tpu_custom_call.1
= control target key start
LH: loop header
LB: loop body
LE: loop exit
PB: predicated region body
PF: predicated region fallthrough
CT: control target
= control target key end

     0   :  { %9 = vsyncpa [#allocation4], 0  ;;  %s802_s0 = inlined_call_operand.vmem [shape: f32[16,32], index: 0, kind: input, shape index: {}]   ;;  %s803_s1 = inlined_call_operand.vmem [shape: s8[32,128], index: 1, kind: input, shape index: {}]   ;;  %s804_s2 = inlined_call_operand.vmem [shape: s8[128,32], index: 2, kind: input, shape index: {}]   ;;  %s805_s3 = inlined_call_operand.vmem [shape: f32[2], index: 3, kind: input, shape index: {}]   ;;  %s806_s4 = inlined_call_operand.hbm [shape: f32[16,32], index: 4, kind: output, shape index: {}]  }
   0x1   :  { %10 = vsyncpa [#allocation3], 0 }
   0x2   :  { %12 = vsyncpa [#allocation3 + $0x1], 0  ;;  %s690_s15 = smov 0   ;;  %s692_s16 = smov 0  }
   0x3   :  { %s694_s17 = smov 0   ;;  %s696_s18 = smov 0  }
   0x4 LB: > { %s711_s19 = sadd.s32 4294967295, %s660_s18   ;;  %s485_s20 = sadd.s32 4294967294, %s660_s18   ;;  %s660_s18 = sphi %s696_s18, %s812_s18   ;;  %s656_s17 = sphi %s694_s17, %s811_s17   ;;  %s652_s16 = sphi %s692_s16, %s810_s16   ;;  %s648_s15 = sphi %s690_s15, %s809_s15  }
   0x5   : > { %s715_s21 = sadd.s32 1, %s660_s18   ;;  %s114_s22 = sadd.s32 1, %s656_s17 }
   0x6   : > { %s111_s23 = ssub.s32 %s660_s18, %s715_s21  ;;  %p124_p0 = scmp.ne.s32.totalorder %s656_s17, %s652_s16 }
   0x7   : > { %p112_p1 = scmp.eq.s32.totalorder %s111_s23, 0  ;;  %p125_p2 = scmp.eq.s32.totalorder %s711_s19, 1 }
   0x8   : > { %p130_p3 = scmp.ne.s32.totalorder %s652_s16, %s648_s15  ;;  %p131_p4 = scmp.eq.s32.totalorder %s485_s20, 1 }
   0x9   : > { %s726_s24 = scalar_select %p112_p1, %s656_s17, %s114_s22  }
   0xa   : > { %p728_p5 = por %p125_p2, %p124_p0  ;;  %p732_p6 = por %p131_p4, %p130_p3 }
   0xb   : > { %p486_p7 = scmp.ge.s32.totalorder %s660_s18, 1  ;;  %p138_p8 = scmp.lt.s32.totalorder %s660_s18, 3 }
   0xc   : > { %p529_p9 = scmp.eq.s32.totalorder %s711_s19, 0  ;;  %s156_s29 = sshll.u32 %s805_s3, 4  ;;  %s157_s29 = int_to_ptr.vmem [resolvable:$true] %s156_s29 }
   0xd   : > { %p139_p10 = pnand %p486_p7, %p138_p8  ;;  %s662_s30 = smov [#allocation2]  }
   0xf   : > { %p521_p11 = pneg %p139_p10  ;;  %176 = sbr.rel (%p139_p10) target bundleno = 884 (0x374), region = 36 }
  0x11   : > { %p522_p12 = pnand %p529_p9, %p521_p11 }
  0x13   : > { %524 = dma.vmem_to_smem (!%p522_p12), %s157_s29, 16, %s662_s30, [#allocation4]  }
  0x14   : > { %639 = dma.done.wait (%p529_p9), [#allocation4], 16  }
  0x15   : > { %641 = vsyncadd (%p529_p9), [#allocation4], 4294967280 }
  0x16   : > { %183 = sfence }
  0x17   : > { %p203_p13 = scmp.lt.s32.totalorder %s711_s19, 1  ;;  %vm212_vm0 = vcmask 261120   ;;  %v663_v3 = vmov 32.0   ;;  %v259_v23 = vld [vmem:[%s803_s1] sm:$0xff]  ;;  %s209_s12 = sld [smem:[#allocation2]]  ;;  %v664_v63 = vmov 128.0  }
  0x18   : > { %567 = vrcp.f32 %v663_v3  ;;  %v262_v24 = vunpack.c.2.s8 %v259_v23  ;;  %v263_v25 = vunpack.c.3.s8 %v259_v23  ;;  %v260_v26 = vunpack.c.0.s8 %v259_v23  ;;  %s496_s8 = sshll.u32 %s711_s19, 3  ;;  %s614_s29 = scalar_lea.hbm %s806_s4, 16 }
  0x19   : > { %s204_s5 = scalar_select %p203_p13, %s711_s19, 1  ;;  %v261_v27 = vunpack.c.1.s8 %v259_v23 }
  0x1a   : > { %v266_v28 = vcvt.s32.f32 %v262_v24  ;;  %v267_v29 = vcvt.s32.f32 %v263_v25  ;;  %v264_v30 = vcvt.s32.f32 %v260_v26 }
  0x1b   : > { %s492_s6 = sshll.u32 %s204_s5, 3  ;;  %v265_v31 = vcvt.s32.f32 %v261_v27  ;;  %s493_s5 = sld [smem:[#allocation2 + $0x1]] }
  0x1c   : > { %s206_s9 = scalar_lea.vmem %s802_s0, %s492_s6  ;;  %v269_v32 = vpack.c.bf16 %v267_v29, %v266_v28  ;;  %v338_v28 = vld [vmem:[%s804_s2 + $0x10] sm:$0xff]  ;;  %s200_s6 = sand.u32 1, %s652_s16  }
  0x1d   : > { %v208_v0 = vld [vmem:[%s206_s9] sm:$0xff]  ;;  %v268_v33 = vpack.c.bf16 %v265_v31, %v264_v30  ;;  %s286_s13 = smul.f32 0.007874016, %s209_s12  ;;  %v350_v30 = vunpack.c.2.s8 %v338_v28  ;;  %v351_v31 = vunpack.c.3.s8 %v338_v28  ;;  %s491_s9 = sshll.u32 %s200_s6, 3 }
  0x1e   : > { %v211_v1 = vmul.f32 %v208_v0, %v208_v0  ;;  %v568_v4 = vpop.eup %567  ;;  %279 = vmatpush.bf16.msra.mxu0 %v269_v32  ;;  %s409_s12 = scalar_lea.hbm %s806_s4, %s496_s8  ;;  %s399_s22 = scalar_lea.sflag [#allocation3], %s200_s6 }
  0x1f   : > { %v217_v5 = vmul.f32 32.0, %v568_v4  ;;  %vm221_vm1 = vweird.f32 %v568_v4  ;;  %v287_v56 = vstv %s286_s13  ;;  %v366_v32 = vcvt.s32.f32 %v350_v30  ;;  %s202_s13 = scalar_lea.vmem [#allocation5], %s491_s9  ;;  %s413_s20 = sshll.u32 %s409_s12, 4  ;;  %s414_s20 = int_to_ptr.hbm [resolvable:$true] %s413_s20 }
  0x20   : > { %v213_v2 = vsel %vm212_vm0, %v211_v1, 0.0  ;;  %s411_s14 = sshll.u32 %s202_s13, 4  ;;  %s608_s23 = sshra.s32 %s414_s20, 4  ;;  %s412_s14 = int_to_ptr.vmem [resolvable:$true] %s411_s14  ;;  %s609_s23 = int_to_ptr.hbm [resolvable:$true] %s608_s23 }
  0x21   : > { %214 = vadd.xlane.f32.xlu0 %v213_v2  ;;  %v218_v6 = vsub.f32 1.0, %v217_v5  ;;  %s393_s7 = smul.f32 0.007874016, %s493_s5  ;;  %s610_s19 = scalar_lea.hbm %s609_s23, 8 }
  0x22   : > { %280 = vmatpush.bf16.msra.mxu0 %v268_v33  ;;  %v367_v33 = vcvt.s32.f32 %v351_v31  ;;  %p611_p0 = scmp.ne.s32.totalorder %s609_s23, %s610_s19  ;;  %p615_p3 = scmp.lt.s32.totalorder %s609_s23, %s806_s4 }
  0x23   : > { %v219_v7 = vmul.f32 %v568_v4, %v218_v6  ;;  %p616_p4 = scmp.lt.s32.totalorder %s614_s29, %s610_s19 }
  0x24   : > { %p612_p1 = pnand %p611_p0, %p728_p5 }
  0x25   : > { %v220_v8 = vadd.f32 %v568_v4, %v219_v7  ;;  %p617_p7 = por %p616_p4, %p615_p3 }
  0x26   : > { %p613_p2 = pneg %p612_p1 }
  0x27   : > { %v222_v9 = vsel %vm221_vm1, %v568_v4, %v220_v8 }
  0x28   : > { %p618_p8 = pnand %p617_p7, %p613_p2 }
  0x94   : > { %v215_v10 = vpop.xlane.xlu0 %214 }
  0x95   : > { %v223_v11 = vmul.f32 %v222_v9, %v215_v10 }
  0x97   : > { %v224_v12 = vadd.f32 1e-06, %v223_v11 }
  0x99   : > { %569 = vrsqrt.f32 %v224_v12  ;;  %vm231_vm3 = vweird.f32 %v224_v12 }
  0x9f   : > { %v570_v13 = vpop.eup %569 }
  0xa0   : > { %v226_v14 = vmul.f32 %v570_v13, %v224_v12  ;;  %vm232_vm2 = vweird.f32 %v570_v13 }
  0xa1   : > { %vm233_vm4 = vmor %vm231_vm3, %vm232_vm2 }
  0xa2   : > { %v227_v15 = vmul.f32 %v570_v13, %v226_v14 }
  0xa4   : > { %v228_v16 = vmul.f32 0.5, %v227_v15 }
  0xa6   : > { %v229_v17 = vsub.f32 1.5, %v228_v16 }
  0xa8   : > { %v230_v18 = vmul.f32 %v570_v13, %v229_v17 }
  0xaa   : > { %v234_v19 = vsel %vm233_vm4, %v570_v13, %v230_v18  ;;  %v339_v18 = vld [vmem:[%s804_s2 + $0x18] sm:$0xff] }
  0xab   : > { %v235_v20 = vmul.f32 %v234_v19, %v208_v0  ;;  %v354_v19 = vunpack.c.2.s8 %v339_v18  ;;  %v352_v24 = vunpack.c.0.s8 %v339_v18  ;;  %v353_v25 = vunpack.c.1.s8 %v339_v18 }
  0xad   : > { %v236_v21 = vand.u32 2147483647, %v235_v20  ;;  %v368_v26 = vcvt.s32.f32 %v352_v24  ;;  %v369_v27 = vcvt.s32.f32 %v353_v25 }
  0xaf   : > { %v237_v22 = vsel %vm212_vm0, %v236_v21, -inf  ;;  %v370_v21 = vcvt.s32.f32 %v354_v19  ;;  %v378_v29 = vpack.c.bf16 %v369_v27, %v368_v26 }
  0xb0   : > { %238 = vmax.xlane.f32.xlu0 %v237_v22 }
 0x123   : > { %v239_v34 = vpop.xlane.xlu0 %238 }
 0x124   : > { %v240_v35 = vmax.f32 %v239_v34, 1e-05  ;;  %v377_v34 = vpack.c.bf16 %v367_v33, %v366_v32 }
 0x126   : > { %571 = vrcp.f32 %v240_v35  ;;  %v252_v39 = vand.u32 2147483648, %v240_v35  ;;  %v250_v41 = vand.u32 2147483647, %v240_v35  ;;  %vm246_vm6 = vweird.f32 %v240_v35 }
 0x127   : > { %v288_v57 = vmul.f32 %v287_v56, %v240_v35  ;;  %573 = vrcp.f32 %v664_v63 }
 0x128   : > { %v253_v43 = vor.u32 1.1754944e-38, %v252_v39  ;;  %vm251_vm8 = vcmp.eq.f32.partialorder %v250_v41, 8.507059e+37  ;;  %v337_v39 = vld [vmem:[%s804_s2 + $0x8] sm:$0xff] }
 0x12c   : > { %v572_v36 = vpop.eup %571 }
 0x12d   : > { %v242_v37 = vmul.f32 %v572_v36, %v240_v35  ;;  %vm247_vm5 = vweird.f32 %v572_v36  ;;  %v574_v0 = vpop.eup %573  ;;  %v348_v35 = vunpack.c.0.s8 %v338_v28 }
 0x12e   : > { %vm248_vm7 = vmor %vm246_vm6, %vm247_vm5  ;;  %v295_v1 = vmul.f32 128.0, %v574_v0  ;;  %vm299_vm10 = vweird.f32 %v574_v0 }
 0x12f   : > { %v243_v38 = vsub.f32 1.0, %v242_v37  ;;  %v364_v37 = vcvt.s32.f32 %v348_v35 }
 0x130   : > { %v296_v2 = vsub.f32 1.0, %v295_v1 }
 0x131   : > { %v244_v40 = vmul.f32 %v572_v36, %v243_v38 }
 0x132   : > { %v297_v3 = vmul.f32 %v574_v0, %v296_v2 }
 0x133   : > { %v245_v42 = vadd.f32 %v572_v36, %v244_v40  ;;  %v336_v40 = vld [vmem:[%s804_s2] sm:$0xff] }
 0x134   : > { %v298_v4 = vadd.f32 %v574_v0, %v297_v3 }
 0x135   : > { %v249_v44 = vsel %vm248_vm7, %v572_v36, %v245_v42  ;;  %v349_v36 = vunpack.c.1.s8 %v338_v28  ;;  %v346_v42 = vunpack.c.2.s8 %v337_v39 }
 0x136   : > { %v254_v45 = vsel %vm251_vm8, %v253_v43, %v249_v44  ;;  %v300_v5 = vsel %vm299_vm10, %v574_v0, %v298_v4  ;;  %v347_v43 = vunpack.c.3.s8 %v337_v39  ;;  %v344_v44 = vunpack.c.0.s8 %v337_v39 }
 0x137   : > { %v255_v46 = vmul.f32 127.0, %v254_v45  ;;  %v365_v38 = vcvt.s32.f32 %v349_v36  ;;  %v345_v45 = vunpack.c.1.s8 %v337_v39 }
 0x139   : > { %v256_v47 = vmul.f32 %v255_v46, %v235_v20  ;;  %v355_v20 = vunpack.c.3.s8 %v339_v18  ;;  %v376_v41 = vpack.c.bf16 %v365_v38, %v364_v37  ;;  %v342_v46 = vunpack.c.2.s8 %v336_v40 }
 0x13b   : > { %v501_v48 = vcvt.f32.s32 %v256_v47  ;;  %v499_v50 = vand.u32 2147483647, %v256_v47  ;;  %v504_v52 = vand.u32 2147483648, %v256_v47  ;;  %v371_v22 = vcvt.s32.f32 %v355_v20 }
 0x13d   : > { %v502_v49 = vcvt.s32.f32 %v501_v48  ;;  %vm500_vm9 = vcmp.lt.f32.partialorder %v499_v50, 8388608.0  ;;  %v379_v23 = vpack.c.bf16 %v371_v22, %v370_v21  ;;  %v363_v48 = vcvt.s32.f32 %v347_v43 }
 0x13e   : > { %v343_v50 = vunpack.c.3.s8 %v336_v40 }
 0x13f   : > { %v503_v51 = vand.u32 2147483647, %v502_v49  ;;  %380 = vmatpush.bf16.msra.mxu1 %v379_v23  ;;  %v360_v49 = vcvt.s32.f32 %v344_v44 }
 0x140   : > { %v359_v56 = vcvt.s32.f32 %v343_v50 }
 0x141   : > { %v505_v53 = vor.u32 %v504_v52, %v503_v51  ;;  %v361_v51 = vcvt.s32.f32 %v345_v45 }
 0x143   : > { %v506_v54 = vsel %vm500_vm9, %v505_v53, %v256_v47  ;;  %381 = vmatpush.bf16.msra.mxu1 %v378_v29  ;;  %v362_v47 = vcvt.s32.f32 %v346_v42  ;;  %v340_v53 = vunpack.c.0.s8 %v336_v40 }
 0x144   : > { %v258_v55 = vpack.c.bf16 %v506_v54, %v506_v54  ;;  %v374_v54 = vpack.c.bf16 %v361_v51, %v360_v49 }
 0x145   : > { %v375_v52 = vpack.c.bf16 %v363_v48, %v362_v47 }
 0x146   : > { %494 = vmatmul.msk.bf16.vlgmr.msra.gmra.mxu0 %vm212_vm0, %v258_v55  ;;  %v358_v55 = vcvt.s32.f32 %v342_v46 }
 0x147   : > { %382 = vmatpush.bf16.msra.mxu1 %v377_v34 }
 0x14b   : > { %383 = vmatpush.bf16.msra.mxu1 %v376_v41 }
 0x14f   : > { %384 = vmatpush.bf16.msra.mxu1 %v375_v52 }
 0x153   : > { %385 = vmatpush.bf16.msra.mxu1 %v374_v54 }
 0x1c3   : > { %v282_v58 = vpop.f32.mrf.mxu0 }
 0x1c4   : > { %v289_v59 = vmul.f32 %v288_v57, %v282_v58  ;;  %v341_v57 = vunpack.c.1.s8 %v336_v40  ;;  %v373_v58 = vpack.c.bf16 %v359_v56, %v358_v55 }
 0x1c6   : > { %v290_v60 = vmax.f32 %v289_v59, 0.0  ;;  %v356_v59 = vcvt.s32.f32 %v340_v53  ;;  %386 = vmatpush.bf16.msra.mxu1 %v373_v58 }
 0x1c8   : > { %v291_v61 = vmul.f32 %v290_v60, %v290_v60 }
 0x1ca   : > { %292 = vadd.xlane.f32.xlu1 %v291_v61 }
 0x1cb   : > { %v284_v62 = vpop.f32.mrf.mxu0 }
 0x23d   : > { %v293_v6 = vpop.xlane.xlu1 %292 }
 0x23e   : > { %v301_v7 = vmul.f32 %v300_v5, %v293_v6 }
 0x240   : > { %v302_v8 = vadd.f32 1e-06, %v301_v7 }
 0x242   : > { %575 = vrsqrt.f32 %v302_v8  ;;  %vm309_vm12 = vweird.f32 %v302_v8 }
 0x248   : > { %v576_v9 = vpop.eup %575 }
 0x249   : > { %v304_v10 = vmul.f32 %v576_v9, %v302_v8  ;;  %vm310_vm11 = vweird.f32 %v576_v9 }
 0x24a   : > { %vm311_vm13 = vmor %vm309_vm12, %vm310_vm11 }
 0x24b   : > { %v305_v11 = vmul.f32 %v576_v9, %v304_v10 }
 0x24d   : > { %v306_v12 = vmul.f32 0.5, %v305_v11 }
 0x24f   : > { %v307_v13 = vsub.f32 1.5, %v306_v12 }
 0x251   : > { %v308_v14 = vmul.f32 %v576_v9, %v307_v13 }
 0x253   : > { %v312_v15 = vsel %vm311_vm13, %v576_v9, %v308_v14 }
 0x254   : > { %v753_v16 = vmul.f32 %v312_v15, %v290_v60  ;;  %v357_v60 = vcvt.s32.f32 %v341_v57 }
 0x256   : > { %v314_v17 = vand.u32 2147483647, %v753_v16  ;;  %v372_v61 = vpack.c.bf16 %v357_v60, %v356_v59 }
 0x258   : > { %315 = vmax.xlane.f32.xlu1 %v314_v17  ;;  %387 = vmatpush.bf16.msra.mxu1 %v372_v61 }
 0x2cb   : > { %v316_v62 = vpop.xlane.xlu1 %315 }
 0x2cc   : > { %v317_v63 = vmax.f32 %v316_v62, 1e-05 }
 0x2ce   : > { %577 = vrcp.f32 %v317_v63  ;;  %v329_v3 = vand.u32 2147483648, %v317_v63  ;;  %v327_v5 = vand.u32 2147483647, %v317_v63  ;;  %vm323_vm15 = vweird.f32 %v317_v63 }
 0x2d0   : > { %v330_v7 = vor.u32 1.1754944e-38, %v329_v3  ;;  %vm328_vm2 = vcmp.eq.f32.partialorder %v327_v5, 8.507059e+37 }
 0x2d4   : > { %v578_v0 = vpop.eup %577 }
 0x2d5   : > { %v319_v1 = vmul.f32 %v578_v0, %v317_v63  ;;  %vm324_vm14 = vweird.f32 %v578_v0 }
 0x2d6   : > { %vm325_vm1 = vmor %vm323_vm15, %vm324_vm14 }
 0x2d7   : > { %v320_v2 = vsub.f32 1.0, %v319_v1 }
 0x2d9   : > { %v321_v4 = vmul.f32 %v578_v0, %v320_v2 }
 0x2db   : > { %v322_v6 = vadd.f32 %v578_v0, %v321_v4 }
 0x2dd   : > { %v326_v8 = vsel %vm325_vm1, %v578_v0, %v322_v6 }
 0x2de   : > { %v331_v9 = vsel %vm328_vm2, %v330_v7, %v326_v8 }
 0x2df   : > { %v332_v10 = vmul.f32 127.0, %v331_v9 }
 0x2e1   : > { %v333_v11 = vmul.f32 %v332_v10, %v753_v16  ;;  %v394_v16 = vstv %s393_s7 }
 0x2e2   : > { %v395_v21 = vmul.f32 %v394_v16, %v317_v63 }
 0x2e3   : > { %v509_v12 = vcvt.f32.s32 %v333_v11  ;;  %v507_v14 = vand.u32 2147483647, %v333_v11  ;;  %v512_v17 = vand.u32 2147483648, %v333_v11 }
 0x2e5   : > { %v510_v13 = vcvt.s32.f32 %v509_v12  ;;  %vm508_vm3 = vcmp.lt.f32.partialorder %v507_v14, 8388608.0 }
 0x2e7   : > { %v511_v15 = vand.u32 2147483647, %v510_v13 }
 0x2e9   : > { %v513_v18 = vor.u32 %v512_v17, %v511_v15 }
 0x2eb   : > { %v514_v19 = vsel %vm508_vm3, %v513_v18, %v333_v11 }
 0x2ec   : > { %v335_v20 = vpack.c.bf16 %v514_v19, %v514_v19 }
 0x2ee   : > { %388 = vmatmul.bf16.vlgmr.msra.gmra.mxu1 %v335_v20 }
 0x36b   : > { %v389_v22 = vpop.f32.mrf.mxu1 }
 0x36c   : > { %v396_v23 = vmul.f32 %v395_v21, %v389_v22 }
 0x36e   : > { %397 = vst.msk [vmem:[%s202_s13] sm:$0xff] %vm212_vm0, %v396_v23 }
 0x36f   : > { %621 = shalt.err (!%p618_p8)
}
 0x370   : > { %519 = dma.vmem_to_hbm [thread:$0]  (%p728_p5), %s412_s14, 128, %s414_s20, %s399_s22  }
 0x373   : > { %v391_v24 = vpop.f32.mrf.mxu1 }
 0x374 PF: > { %p531_p9 = scmp.ge.s32.totalorder %s660_s18, 2  ;;  %s425_s6 = sand.u32 1, %s648_s15  }
 0x375   : > { %s426_s7 = scalar_lea.sflag [#allocation3], %s425_s6 }
 0x376   : > { %p526_p10 = pnand %p531_p9, %p732_p6 }
 0x378   : > { %p527_p11 = pneg %p526_p10 }
 0x37a   : > { %643 = dma.done.wait (%p527_p11), %s426_s7, 128  }
 0x37b   : > { %645 = vsyncadd (%p527_p11), %s426_s7, 4294967168  ;;  %p15_p12 = scmp.ge.s32.totalorder %s715_s21, 4   ;;  %s809_s15 = smov %s652_s16 }
 0x37c   : > { %s810_s16 = smov %s656_s17  ;;  %s811_s17 = smov %s726_s24 }
 0x37d   : > { %s812_s18 = smov %s715_s21  ;;  %17 = sbr.rel (!%p15_p12) target bundleno = 4 (0x4), region = 76 }
 0x382   :  { %432 = vsyncpa [#allocation3], 1 }
 0x383   :  { %434 = vsyncpa [#allocation3 + $0x1], 1 }
 0x384   :  { %435 = vsyncpa [#allocation4], 1 }
 0x385   :  { %437 = vsyncpa [#allocation4 + $0x1], 1 }

</bundles_post_ra>
